<compile_context>
chip_gen: v5e
topology: v5e:2x2
jax: 0.10.0
libtpu: 0.0.40
codegen_flags: <defaults>
</compile_context>

<pallas_src>
import functools

import jax
import jax.numpy as jnp
from jax.experimental import pallas as pl
from jax.experimental.pallas import tpu as pltpu


def _round_up(x, m):
    return (x + m - 1) // m * m


def _rebnconv_kernel(x_ref, w_ref, bias_ref, o_ref, *, dirate):
    # x_ref:    (1, TH + 2*dirate, W, K)  kx-stacked, zero-padded rows; K = 3*Cin
    # w_ref:    (3, K, Cout_p)            per-ky weights (kx folded into K,
    #                                      BN scale folded into the weights)
    # bias_ref: (1, Cout_p)               folded BN bias (includes conv bias)
    # o_ref:    (1, TH, W, Cout_p)
    _, TH, W, Cout_p = o_ref.shape
    K = x_ref.shape[-1]

    acc = None
    for ky in range(3):
        # Contiguous slice along H only -> (TH, W, K); reshape merges (TH, W)
        # into the matmul M dim without touching the lane (K) axis.
        patch = x_ref[0, ky * dirate:ky * dirate + TH, :, :].reshape(TH * W, K)
        contrib = jnp.dot(patch, w_ref[ky], preferred_element_type=jnp.float32)
        acc = contrib if acc is None else acc + contrib

    y = jnp.maximum(acc + bias_ref[...], 0.0)            # +bias, ReLU
    o_ref[0] = y.reshape(TH, W, Cout_p).astype(o_ref.dtype)


def _pick_tile_h(H, W, K, Cout_p, pad, itemsize, budget_bytes=10 * 1024 * 1024):
    """Largest H-tile (divisor of H) whose double-buffered blocks fit the budget."""
    def est(th):
        in_blk = (th + 2 * pad) * W * K * itemsize
        out_blk = th * W * Cout_p * itemsize
        acc = th * W * Cout_p * 4                 # f32 accumulation live values
        wts = 3 * K * Cout_p * itemsize + 2 * Cout_p * 4
        return 2 * (in_blk + out_blk) + acc + 2 * wts

    candidates = [H] + [t for t in (512, 256, 128, 64, 32, 16, 8)
                        if t < H and H % t == 0]
    for t in candidates:
        if est(t) <= budget_bytes:
            return t
    return candidates[-1]


def rebnconv_forward_nhwc(x_nhwc, conv_w, conv_b, gamma, beta, run_mean,
                          run_var, *, dirate=1, eps=1e-5, tile_h=None):
    """REBNCONV forward on NHWC input; returns NHWC output (preferred entry)."""
    N, H, W, Cin = x_nhwc.shape
    Cout = conv_w.shape[0]
    pad = dirate  # nn.Conv2d(..., padding=1*dirate, dilation=1*dirate)
    dtype = x_nhwc.dtype
    itemsize = jnp.dtype(dtype).itemsize

    # --- wrapper-side prep (plain JAX / XLA) -------------------------------
    # Zero padding (spatial) + kx-im2col: stack the 3 horizontal taps along the
    # channel axis so the W dim needs no halo inside the kernel.
    xp = jnp.pad(x_nhwc, ((0, 0), (pad, pad), (pad, pad), (0, 0)))
    Hp = H + 2 * pad
    x_s = jnp.concatenate(
        [xp[:, :, kx * dirate:kx * dirate + W, :] for kx in range(3)], axis=-1)
    K = 3 * Cin

    # Eval-mode BN: fold scale into the conv weights, fold (bias - mean) * scale
    # + beta into a per-channel bias.
    inv = gamma / jnp.sqrt(run_var + eps)
    w_f = conv_w * inv.reshape(-1, 1, 1, 1)

    # Weights: (Cout, Cin, 3, 3) -> (ky, kx*Cin + ci, co); keep activation dtype
    # for the MXU (bf16-friendly); pad Cout to a lane-dense multiple of 128.
    Cout_p = _round_up(Cout, 128)
    w_t = jnp.transpose(w_f, (2, 3, 1, 0)).reshape(3, K, Cout).astype(dtype)
    w_t = jnp.pad(w_t, ((0, 0), (0, 0), (0, Cout_p - Cout)))
    bias = jnp.pad(((conv_b - run_mean) * inv + beta).astype(jnp.float32),
                   (0, Cout_p - Cout)).reshape(1, Cout_p)

    # --- tiling ------------------------------------------------------------
    if tile_h is None:
        tile_h = _pick_tile_h(H, W, K, Cout_p, pad, itemsize)
    assert H % tile_h == 0, f"tile_h={tile_h} must divide H={H}"
    TH = tile_h

    cost = pl.CostEstimate(
        flops=2 * N * H * W * 9 * Cin * Cout,
        transcendentals=0,
        bytes_accessed=int((N * Hp * W * K + N * H * W * Cout_p
                            + 3 * K * Cout_p) * itemsize))

    def _call(th, halo_tiling):
        n_h = H // th
        win = th + 2 * pad
        if halo_tiling:
            # Overlapping halo window on H via element-offset indexing.
            x_h_dim = pl.Element(win)
            x_idx = lambda n, h: (n, h * th, 0, 0)
        else:
            # Whole padded image per batch element: plain Blocked (full H dim).
            x_h_dim = win
            x_idx = lambda n, h: (n, 0, 0, 0)

        grid_spec = pltpu.PrefetchScalarGridSpec(
            num_scalar_prefetch=0,
            grid=(N, n_h),
            in_specs=[
                pl.BlockSpec((1, x_h_dim, W, K), x_idx),
                pl.BlockSpec((3, K, Cout_p), lambda n, h: (0, 0, 0)),
                pl.BlockSpec((1, Cout_p), lambda n, h: (0, 0)),
            ],
            out_specs=pl.BlockSpec((1, th, W, Cout_p),
                                   lambda n, h: (n, h, 0, 0)),
        )
        return pl.pallas_call(
            functools.partial(_rebnconv_kernel, dirate=dirate),
            out_shape=jax.ShapeDtypeStruct((N, H, W, Cout_p), dtype),
            grid_spec=grid_spec,
            compiler_params=pltpu.CompilerParams(
                dimension_semantics=("parallel", "parallel"),
                vmem_limit_bytes=32 * 1024 * 1024),
            cost_estimate=cost,
        )(x_s, w_t, bias)

    if TH == H:
        out_nhwc = _call(H, False)
    else:
        try:
            out_nhwc = _call(TH, True)
        except Exception:
            # Safety net: if element-offset (halo) indexing is unavailable,
            # fall back to one full-image block per batch element (still
            # kx-stacked, lane-padded, f32-accumulated).
            out_nhwc = _call(H, False)

    return out_nhwc[..., :Cout]


def rebnconv_forward(x_nchw, conv_w, conv_b, gamma, beta, run_mean, run_var,
                     *, dirate=1, eps=1e-5, tile_h=None):
    """PyTorch-style NCHW interface; prefer rebnconv_forward_nhwc in NHWC nets."""
    x = jnp.transpose(x_nchw, (0, 2, 3, 1))                       # NCHW -> NHWC
    y = rebnconv_forward_nhwc(x, conv_w, conv_b, gamma, beta, run_mean,
                              run_var, dirate=dirate, eps=eps, tile_h=tile_h)
    return jnp.transpose(y, (0, 3, 1, 2))                         # NHWC -> NCHW


def _reference(x, w, b, gamma, beta, mean, var, dirate, eps=1e-5):
    y = jax.lax.conv_general_dilated(
        x, w, window_strides=(1, 1),
        padding=((dirate, dirate), (dirate, dirate)),
        rhs_dilation=(dirate, dirate),
        dimension_numbers=("NCHW", "OIHW", "NCHW"))
    y = y + b.reshape(1, -1, 1, 1)
    y = (y - mean.reshape(1, -1, 1, 1)) * (
        gamma.reshape(1, -1, 1, 1) / jnp.sqrt(var.reshape(1, -1, 1, 1) + eps))
    y = y + beta.reshape(1, -1, 1, 1)
    return jnp.maximum(y, 0.0)


if __name__ == "__main__":
    key = jax.random.PRNGKey(0)
    k_x, k_w, k_b, k_g, k_be, k_m, k_v = jax.random.split(key, 7)

    N, Cin, Cout, H, W = 2, 4, 4, 16, 16

    x = jax.random.normal(k_x, (N, Cin, H, W), jnp.float32)

    # Deterministic synthetic parameters (Conv2d(in=4, out=4, k=3) + BN(4)).
    conv_w = 0.1 * jax.random.normal(k_w, (Cout, Cin, 3, 3), jnp.float32)
    conv_b = 0.1 * jax.random.normal(k_b, (Cout,), jnp.float32)
    gamma = 1.0 + 0.1 * jax.random.normal(k_g, (Cout,), jnp.float32)
    beta = 0.1 * jax.random.normal(k_be, (Cout,), jnp.float32)
    run_mean = 0.1 * jax.random.normal(k_m, (Cout,), jnp.float32)
    run_var = 1.0 + 0.1 * jax.nn.softplus(
        jax.random.normal(k_v, (Cout,), jnp.float32))

    ref1 = _reference(x, conv_w, conv_b, gamma, beta, run_mean, run_var, 1)

    # Halo-tiling path (2 H-tiles per image) for both dilation rates.
    for dirate in (1, 2):
        out = rebnconv_forward(x, conv_w, conv_b, gamma, beta, run_mean,
                               run_var, dirate=dirate, tile_h=8)
        out = jax.block_until_ready(out)
        ref = _reference(x, conv_w, conv_b, gamma, beta, run_mean, run_var,
                         dirate)
        assert out.shape == (N, Cout, H, W)
        err = float(jnp.max(jnp.abs(out - ref)))
        assert jnp.allclose(out, ref, atol=1e-4, rtol=1e-4), \
            f"dirate={dirate}: max abs err = {err}"

    # Auto-tiled (full-image block) path.
    out = rebnconv_forward(x, conv_w, conv_b, gamma, beta, run_mean, run_var,
                           dirate=1)
    out = jax.block_until_ready(out)
    err = float(jnp.max(jnp.abs(out - ref1)))
    assert jnp.allclose(out, ref1, atol=1e-4, rtol=1e-4), \
        f"auto-tile: max abs err = {err}"

    print("KERNEL_OK")
</pallas_src>

<mosaic_0001>
module attributes {stable_mosaic.version = 11 : i64} {
  func.func @_rebnconv_kernel(%arg0: i32, %arg1: i32, %arg2: memref<1x18x16x12xf32, #tpu.memory_space<vmem>>, %arg3: memref<3x12x128xf32, #tpu.memory_space<vmem>>, %arg4: memref<1x128xf32, #tpu.memory_space<vmem>>, %arg5: memref<1x16x16x128xf32, #tpu.memory_space<vmem>>) attributes {dimension_semantics = [#tpu.dimension_semantics<parallel>, #tpu.dimension_semantics<parallel>], iteration_bounds = array<i64: 2, 1>, scalar_prefetch = 0 : i64, scratch_operands = 0 : i64, tpu.core_type = #tpu.core_type<tc>, window_params = [{transform_indices = @transform_0, window_bounds = array<i64: 1, 18, 16, 12>}, {pipeline_mode = #tpu.pipeline_mode<synchronous>, transform_indices = @transform_1, window_bounds = array<i64: 3, 12, 128>}, {pipeline_mode = #tpu.pipeline_mode<synchronous>, transform_indices = @transform_2, window_bounds = array<i64: 1, 128>}, {transform_indices = @transform_3, window_bounds = array<i64: 1, 16, 16, 128>}]} {
    %c0 = arith.constant 0 : index
    %c0_0 = arith.constant 0 : index
    %c0_1 = arith.constant 0 : index
    %c0_2 = arith.constant 0 : index
    %0 = vector.load %arg2[%c0, %c0_0, %c0_1, %c0_2] : memref<1x18x16x12xf32, #tpu.memory_space<vmem>>, vector<1x16x16x12xf32>
    %1 = vector.shape_cast %0 : vector<1x16x16x12xf32> to vector<16x16x12xf32>
    %2 = vector.shape_cast %1 : vector<16x16x12xf32> to vector<256x12xf32>
    %c0_3 = arith.constant 0 : index
    %c0_4 = arith.constant 0 : index
    %c0_5 = arith.constant 0 : index
    %3 = vector.load %arg3[%c0_3, %c0_4, %c0_5] : memref<3x12x128xf32, #tpu.memory_space<vmem>>, vector<1x12x128xf32>
    %4 = vector.shape_cast %3 : vector<1x12x128xf32> to vector<12x128xf32>
    %cst = arith.constant dense<0.000000e+00> : vector<256x128xf32>
    %5 = tpu.matmul %2, %4, %cst {dimension_numbers = #tpu.dot_dimension_numbers<[1], [0], [0], [1], [0, 0, 1, 1], [], []>} : vector<256x12xf32>, vector<12x128xf32>, vector<256x128xf32> -> vector<256x128xf32>
    %c0_6 = arith.constant 0 : index
    %c1 = arith.constant 1 : index
    %c0_7 = arith.constant 0 : index
    %c0_8 = arith.constant 0 : index
    %6 = vector.load %arg2[%c0_6, %c1, %c0_7, %c0_8] : memref<1x18x16x12xf32, #tpu.memory_space<vmem>>, vector<1x16x16x12xf32>
    %7 = vector.shape_cast %6 : vector<1x16x16x12xf32> to vector<16x16x12xf32>
    %8 = vector.shape_cast %7 : vector<16x16x12xf32> to vector<256x12xf32>
    %c1_9 = arith.constant 1 : index
    %c0_10 = arith.constant 0 : index
    %c0_11 = arith.constant 0 : index
    %9 = vector.load %arg3[%c1_9, %c0_10, %c0_11] : memref<3x12x128xf32, #tpu.memory_space<vmem>>, vector<1x12x128xf32>
    %10 = vector.shape_cast %9 : vector<1x12x128xf32> to vector<12x128xf32>
    %cst_12 = arith.constant dense<0.000000e+00> : vector<256x128xf32>
    %11 = tpu.matmul %8, %10, %cst_12 {dimension_numbers = #tpu.dot_dimension_numbers<[1], [0], [0], [1], [0, 0, 1, 1], [], []>} : vector<256x12xf32>, vector<12x128xf32>, vector<256x128xf32> -> vector<256x128xf32>
    %12 = arith.addf %5, %11 : vector<256x128xf32>
    %c0_13 = arith.constant 0 : index
    %c2 = arith.constant 2 : index
    %c0_14 = arith.constant 0 : index
    %c0_15 = arith.constant 0 : index
    %13 = vector.load %arg2[%c0_13, %c2, %c0_14, %c0_15] : memref<1x18x16x12xf32, #tpu.memory_space<vmem>>, vector<1x16x16x12xf32>
    %14 = vector.shape_cast %13 : vector<1x16x16x12xf32> to vector<16x16x12xf32>
    %15 = vector.shape_cast %14 : vector<16x16x12xf32> to vector<256x12xf32>
    %c2_16 = arith.constant 2 : index
    %c0_17 = arith.constant 0 : index
    %c0_18 = arith.constant 0 : index
    %16 = vector.load %arg3[%c2_16, %c0_17, %c0_18] : memref<3x12x128xf32, #tpu.memory_space<vmem>>, vector<1x12x128xf32>
    %17 = vector.shape_cast %16 : vector<1x12x128xf32> to vector<12x128xf32>
    %cst_19 = arith.constant dense<0.000000e+00> : vector<256x128xf32>
    %18 = tpu.matmul %15, %17, %cst_19 {dimension_numbers = #tpu.dot_dimension_numbers<[1], [0], [0], [1], [0, 0, 1, 1], [], []>} : vector<256x12xf32>, vector<12x128xf32>, vector<256x128xf32> -> vector<256x128xf32>
    %19 = arith.addf %12, %18 : vector<256x128xf32>
    %c0_20 = arith.constant 0 : index
    %c0_21 = arith.constant 0 : index
    %20 = vector.load %arg4[%c0_20, %c0_21] : memref<1x128xf32, #tpu.memory_space<vmem>>, vector<1x128xf32>
    %21 = vector.broadcast %20 : vector<1x128xf32> to vector<256x128xf32>
    %22 = arith.addf %19, %21 : vector<256x128xf32>
    %cst_22 = arith.constant 0.000000e+00 : f32
    %23 = vector.broadcast %cst_22 : f32 to vector<256x128xf32>
    %24 = arith.maximumf %22, %23 : vector<256x128xf32>
    %25 = vector.shape_cast %24 : vector<256x128xf32> to vector<16x16x128xf32>
    %c0_23 = arith.constant 0 : index
    %c0_24 = arith.constant 0 : index
    %c0_25 = arith.constant 0 : index
    %c0_26 = arith.constant 0 : index
    %26 = vector.load %arg5[%c0_23, %c0_24, %c0_25, %c0_26] : memref<1x16x16x128xf32, #tpu.memory_space<vmem>>, vector<1x16x16x128xf32>
    %27 = vector.shape_cast %26 : vector<1x16x16x128xf32> to vector<16x16x128xf32>
    %28 = vector.shape_cast %25 : vector<16x16x128xf32> to vector<1x16x16x128xf32>
    tpu.vector_store %arg5[%c0_23, %c0_24, %c0_25, %c0_26], %28 {strides = array<i32>} : memref<1x16x16x128xf32, #tpu.memory_space<vmem>>, vector<1x16x16x128xf32>,
    return
  }
  func.func @transform_0(%arg0: i32, %arg1: i32) -> (i32, i32, i32, i32) {
    %c0_i32 = arith.constant 0 : i32
    %c0_i32_0 = arith.constant 0 : i32
    %c0_i32_1 = arith.constant 0 : i32
    %c0_i32_2 = arith.constant 0 : i32
    return %arg0, %c0_i32, %c0_i32_0, %c0_i32_1 : i32, i32, i32, i32
  }
  func.func @transform_1(%arg0: i32, %arg1: i32) -> (i32, i32, i32) {
    %c0_i32 = arith.constant 0 : i32
    %c0_i32_0 = arith.constant 0 : i32
    %c0_i32_1 = arith.constant 0 : i32
    %c0_i32_2 = arith.constant 0 : i32
    return %c0_i32, %c0_i32_0, %c0_i32_1 : i32, i32, i32
  }
  func.func @transform_2(%arg0: i32, %arg1: i32) -> (i32, i32) {
    %c0_i32 = arith.constant 0 : i32
    %c0_i32_0 = arith.constant 0 : i32
    %c0_i32_1 = arith.constant 0 : i32
    return %c0_i32, %c0_i32_0 : i32, i32
  }
  func.func @transform_3(%arg0: i32, %arg1: i32) -> (i32, i32, i32, i32) {
    %c0_i32 = arith.constant 0 : i32
    %c0_i32_0 = arith.constant 0 : i32
    %c0_i32_1 = arith.constant 0 : i32
    return %arg0, %arg1, %c0_i32, %c0_i32_0 : i32, i32, i32, i32
  }
}

</mosaic_0001>

<bundles_post_ra>
// kernel: tpu_custom_call.1
= control target key start
LH: loop header
LB: loop body
LE: loop exit
PB: predicated region body
PF: predicated region fallthrough
CT: control target
= control target key end

     0   :  { %8 = vsyncpa [#allocation3], 0  ;;  %s1946_s0 = inlined_call_operand.vmem [shape: f32[2,18,16,12], index: 0, kind: input, shape index: {}]   ;;  %s1947_s1 = inlined_call_operand.vmem [shape: f32[3,12,128], index: 1, kind: input, shape index: {}]   ;;  %s1948_s2 = inlined_call_operand.vmem [shape: f32[1,128], index: 2, kind: input, shape index: {}]   ;;  %s1949_s3 = inlined_call_operand.hbm [shape: f32[2,16,16,128], index: 3, kind: output, shape index: {}]  }
   0x1   :  { %10 = vsyncpa [#allocation3 + $0x1], 0  ;;  %s1499_s12 = smov 0   ;;  %s1501_s13 = smov 0  }
   0x2   :  { %s1503_s14 = smov 0   ;;  %s1505_s15 = smov 0  }
   0x3   :  { %s1507_s16 = smov 0   ;;  %s1509_s17 = smov 0  }
   0x4 LB: > { %s1152_s18 = sadd.s32 4294967295, %s1475_s17   ;;  %s1153_s19 = sadd.s32 4294967294, %s1475_s17   ;;  %s1475_s17 = sphi %s1509_s17, %s16_s17   ;;  %s1471_s16 = sphi %s1507_s16, %s1956_s16   ;;  %s1467_s15 = sphi %s1505_s15, %s1955_s15   ;;  %s1463_s14 = sphi %s1503_s14, %s1954_s14   ;;  %s1459_s13 = sphi %s1501_s13, %s1953_s13   ;;  %s1455_s12 = sphi %s1499_s12, %s1952_s12  }
   0x5   : > { %s28_s20 = sadd.s32 1, %s1471_s16  ;;  %s105_s21 = sadd.s32 1, %s1463_s14 }
   0x6   : > { %p30_p0 = scmp.ge.s32.totalorder %s28_s20, 2  ;;  %p115_p1 = scmp.ne.s32.totalorder %s1463_s14, %s1459_s13 }
   0x7   : > { %p116_p2 = scmp.eq.s32.totalorder %s1152_s18, 1  ;;  %p121_p3 = scmp.ne.s32.totalorder %s1459_s13, %s1455_s12 }
   0x8   : > { %s1958_s20 = smov (%p30_p0, %s28_s20), 0  ;;  %p122_p5 = scmp.eq.s32.totalorder %s1153_s19, 1 }
   0x9   : > { %p1539_p4 = por %p116_p2, %p115_p1  ;;  %s100_s23 = ssub.s32 %s1471_s16, %s1958_s20 }
   0xa   : > { %p1156_p6 = scmp.ge.s32.totalorder %s1475_s17, 1  ;;  %p103_p7 = scmp.eq.s32.totalorder %s100_s23, 0 }
   0xb   : > { %p1546_p8 = por %p122_p5, %p121_p3  ;;  %p154_p9 = scmp.lt.s32.totalorder %s1475_s17, 3 }
   0xc   : > { %s1552_s25 = scalar_select %p103_p7, %s1463_s14, %s105_s21  }
   0xd   : > { %p155_p10 = pnand %p1156_p6, %p154_p9 }
   0xe   : > { %p178_p11 = scmp.lt.s32.totalorder (!%p155_p10), %s1467_s15, 1  ;;  %s175_s26 = sand.u32 (!%p155_p10), 1, %s1459_s13  }
   0xf   : > { %158 = sbr.rel (%p155_p10) target bundleno = 354 (0x162), region = 32  ;;  %s1157_s29 = sshll.u32 (!%p155_p10), %s175_s26, 8 }
  0x10   : > { %s1744_s30 = scalar_lea.vmem (!%p155_p10), [#allocation2], %s1157_s29  ;;  %s1331_s4 = sshll.u32 (!%p155_p10), %s1467_s15, 8 }
  0x11   : > { %s1075_s7 = scalar_lea.hbm (!%p155_p10), %s1949_s3, %s1331_s4  ;;  %s1061_s9 = scalar_lea.sflag (!%p155_p10), [#allocation3], %s175_s26 }
  0x12   : > { %s1078_s8 = sshll.u32 (!%p155_p10), %s1075_s7, 4  ;;  %s1417_s21 = scalar_lea.hbm (!%p155_p10), %s1949_s3, 512  ;;  %s1079_s8 = int_to_ptr.hbm [resolvable:$true] %s1078_s8 }
  0x13   : > { %s1411_s10 = sshra.s32 (!%p155_p10), %s1079_s8, 4  ;;  %s1412_s10 = int_to_ptr.hbm [resolvable:$true] %s1411_s10 }
  0x14   : > { %v1192_v0 = vld [vmem:[%s1947_s1 + $0x18] sm:$0xf]  ;;  %vm351_vm0 = vcmask 1043456   ;;  %v1292_v1 = vld [vmem:[%s1947_s1 + $0x28] sm:$0xf]  ;;  %v1191_v2 = vld [vmem:[%s1947_s1 + $0x10] sm:$0xff]  ;;  %p1418_p1 = scmp.lt.s32.totalorder %s1412_s10, %s1949_s3 }
  0x15   : > { %1332 = vmatpush.msk.msra.mxu3 %vm351_vm0, %v1192_v0  ;;  %1293 = vmatpush.msk.msra.mxu2 %vm351_vm0, %v1292_v1  ;;  %v1291_v3 = vld [vmem:[%s1947_s1 + $0x20] sm:$0xff]  ;;  %v217_v4 = vld [vmem:[%s1947_s1 + $0x8] sm:$0xf]  ;;  %s179_s11 = scalar_select %p178_p11, %s1467_s15, 1  ;;  %vm254_vm1 = vcmask 97280  }
  0x16   : > { %1193 = vmatpush.msk.msra.mxu0 %vm351_vm0, %v1192_v0  ;;  %1226 = vmatpush.msk.msra.mxu1 %vm351_vm0, %v217_v4  ;;  %v216_v5 = vld [vmem:[%s1947_s1] sm:$0xff]  ;;  %s1076_s15 = sshll.u32 %s1744_s30, 4  ;;  %s1077_s15 = int_to_ptr.vmem [resolvable:$true] %s1076_s15 }
  0x17   : > { %1333 = vmatpush.msra.mxu3 %v1191_v2  ;;  %830 = vmatpush.msra.mxu2 %v1291_v3  ;;  %s1338_s18 = smul.u32 288, %s179_s11  ;;  %v1728_v40 = vld [vmem:[%s1948_s2] ss:$0 sm:$0xff]  ;;  %s1413_s11 = scalar_lea.hbm %s1412_s10, 256 }
  0x18   : > { %370 = vmatpush.msra.mxu0 %v1191_v2  ;;  %582 = vmatpush.msra.mxu1 %v216_v5  ;;  %p1414_p12 = scmp.ne.s32.totalorder %s1412_s10, %s1413_s11  ;;  %p1419_p2 = scmp.lt.s32.totalorder %s1417_s21, %s1413_s11 }
  0x19   : > { %1334 = vmatpush.msk.msrb.mxu3 %vm351_vm0, %v217_v4  ;;  %s1582_s23 = scalar_lea.vmem %s1946_s0, %s1338_s18 }
  0x1a   : > { %v1585_v6 = vld [vmem:[%s1582_s23 + $0xd0] sm:$0xff]  ;;  %v1259_v7 = vld [vmem:[%s1582_s23 + $0x20] sm:$0xff]  ;;  %v1597_v10 = vld [vmem:[%s1582_s23 + $0xd8] sm:$0xff]  ;;  %p1415_p13 = pnand %p1414_p12, %p1539_p4  ;;  %p1420_p3 = por %p1419_p2, %p1418_p1 }
  0x1b   : > { %1335 = vmatpush.msrb.mxu3 %v216_v5  ;;  %v1159_v8 = vld [vmem:[%s1582_s23 + $0x10] sm:$0xff]  ;;  %1294 = vmatmul.msk.f32.vlgmr.msra.gmra.mxu2 %vm254_vm1, %v1259_v7  ;;  %v184_v9 = vld [vmem:[%s1582_s23] sm:$0xff]  ;;  %v1260_v11 = vld [vmem:[%s1582_s23 + $0x28] sm:$0xff] }
  0x1c   : > { %1218 = vmatmul.msk.f32.vlgmr.msra.gmra.mxu3 %vm254_vm1, %v1585_v6  ;;  %1194 = vmatmul.msk.f32.vlgmr.msra.gmra.mxu0 %vm254_vm1, %v1159_v8  ;;  %v1160_v12 = vld [vmem:[%s1582_s23 + $0x18] sm:$0xff]  ;;  %v185_v13 = vld [vmem:[%s1582_s23 + $0x8] sm:$0xff]  ;;  %v1608_v14 = vld [vmem:[%s1582_s23 + $0xe0] sm:$0xff]  ;;  %p1416_p0 = pneg %p1415_p13 }
  0x1d   : > { %1227 = vmatmul.msk.f32.vlgmr.msra.gmra.mxu1 %vm254_vm1, %v184_v9  ;;  %1336 = vmatpush.msk.msra.mxu3 %vm351_vm0, %v1292_v1  ;;  %v1261_v15 = vld [vmem:[%s1582_s23 + $0x30] sm:$0xff]  ;;  %v1617_v16 = vld [vmem:[%s1582_s23 + $0xe8] sm:$0xff]  ;;  %v1262_v17 = vld [vmem:[%s1582_s23 + $0x38] sm:$0xff] }
  0x1e   : > { %v1626_v18 = vld [vmem:[%s1582_s23 + $0xf0] sm:$0xff]  ;;  %v1263_v19 = vld [vmem:[%s1582_s23 + $0x40] sm:$0xff]  ;;  %v1635_v20 = vld [vmem:[%s1582_s23 + $0xf8] sm:$0xff]  ;;  %p1421_p5 = pnand %p1420_p3, %p1416_p0 }
  0x1f   : > { %1337 = vmatpush.msra.mxu3 %v1291_v3  ;;  %v1264_v21 = vld [vmem:[%s1582_s23 + $0x48] sm:$0xff]  ;;  %v1644_v22 = vld [vmem:[%s1582_s23 + $0x100] sm:$0xff]  ;;  %v1265_v23 = vld [vmem:[%s1582_s23 + $0x50] sm:$0xff] }
  0x20   : > { %v1653_v24 = vld [vmem:[%s1582_s23 + $0x108] sm:$0xff]  ;;  %v1266_v25 = vld [vmem:[%s1582_s23 + $0x58] sm:$0xff]  ;;  %v1662_v26 = vld [vmem:[%s1582_s23 + $0xc0] sm:$0xff] }
  0x21   : > { %v1267_v27 = vld [vmem:[%s1582_s23 + $0x60] sm:$0xff]  ;;  %v1671_v28 = vld [vmem:[%s1582_s23 + $0xc8] sm:$0xff]  ;;  %v1269_v30 = vld [vmem:[%s1582_s23 + $0x70] sm:$0xff] }
  0x22   : > { %v1268_v29 = vld [vmem:[%s1582_s23 + $0x68] sm:$0xff]  ;;  %v1270_v31 = vld [vmem:[%s1582_s23 + $0x78] sm:$0xff]  ;;  %v1271_v32 = vld [vmem:[%s1582_s23 + $0x80] sm:$0xff] }
  0x23   : > { %1295 = vmatmul.msk.f32.gmra.mxu2 %vm254_vm1, %v1260_v11  ;;  %v1272_v33 = vld [vmem:[%s1582_s23 + $0x88] sm:$0xff]  ;;  %v1273_v34 = vld [vmem:[%s1582_s23 + $0x90] sm:$0xff]  ;;  %v1274_v35 = vld [vmem:[%s1582_s23 + $0x98] sm:$0xff] }
  0x24   : > { %1219 = vmatmul.msk.f32.gmra.mxu3 %vm254_vm1, %v1597_v10  ;;  %1195 = vmatmul.msk.f32.gmra.mxu0 %vm254_vm1, %v1160_v12  ;;  %v1716_v36 = vld [vmem:[%s1582_s23 + $0xa0] sm:$0xff]  ;;  %v1735_v44 = vld [vmem:[%s1582_s23 + $0xa8] sm:$0xff]  ;;  %v1750_v53 = vld [vmem:[%s1582_s23 + $0xb0] sm:$0xff] }
  0x25   : > { %1228 = vmatmul.msk.f32.gmra.mxu1 %vm254_vm1, %v185_v13  ;;  %v1764_v62 = vld [vmem:[%s1582_s23 + $0xb8] sm:$0xff] }
  0x2b   : > { %1296 = vmatmul.msk.f32.gmra.mxu2 %vm254_vm1, %v1261_v15 }
  0x2c   : > { %1220 = vmatmul.msk.f32.gmra.mxu3 %vm254_vm1, %v1608_v14  ;;  %1196 = vmatmul.msk.f32.gmra.mxu0 %vm254_vm1, %v1259_v7 }
  0x2d   : > { %1229 = vmatmul.msk.f32.gmra.mxu1 %vm254_vm1, %v1159_v8 }
  0x33   : > { %1297 = vmatmul.msk.f32.gmra.mxu2 %vm254_vm1, %v1262_v17 }
  0x34   : > { %1221 = vmatmul.msk.f32.gmra.mxu3 %vm254_vm1, %v1617_v16  ;;  %1197 = vmatmul.msk.f32.gmra.mxu0 %vm254_vm1, %v1260_v11 }
  0x35   : > { %1230 = vmatmul.msk.f32.gmra.mxu1 %vm254_vm1, %v1160_v12 }
  0x3b   : > { %1298 = vmatmul.msk.f32.gmra.mxu2 %vm254_vm1, %v1263_v19 }
  0x3c   : > { %1222 = vmatmul.msk.f32.gmra.mxu3 %vm254_vm1, %v1626_v18  ;;  %1198 = vmatmul.msk.f32.gmra.mxu0 %vm254_vm1, %v1261_v15 }
  0x3d   : > { %1231 = vmatmul.msk.f32.gmra.mxu1 %vm254_vm1, %v1259_v7 }
  0x43   : > { %1299 = vmatmul.msk.f32.gmra.mxu2 %vm254_vm1, %v1264_v21 }
  0x44   : > { %1223 = vmatmul.msk.f32.gmra.mxu3 %vm254_vm1, %v1635_v20  ;;  %1199 = vmatmul.msk.f32.gmra.mxu0 %vm254_vm1, %v1262_v17 }
  0x45   : > { %1232 = vmatmul.msk.f32.gmra.mxu1 %vm254_vm1, %v1260_v11 }
  0x4b   : > { %1300 = vmatmul.msk.f32.gmra.mxu2 %vm254_vm1, %v1265_v23 }
  0x4c   : > { %1224 = vmatmul.msk.f32.gmra.mxu3 %vm254_vm1, %v1644_v22  ;;  %1200 = vmatmul.msk.f32.gmra.mxu0 %vm254_vm1, %v1263_v19 }
  0x4d   : > { %1233 = vmatmul.msk.f32.gmra.mxu1 %vm254_vm1, %v1261_v15 }
  0x53   : > { %1301 = vmatmul.msk.f32.gmra.mxu2 %vm254_vm1, %v1266_v25 }
  0x54   : > { %1225 = vmatmul.msk.f32.gmra.mxu3 %vm254_vm1, %v1653_v24  ;;  %1201 = vmatmul.msk.f32.gmra.mxu0 %vm254_vm1, %v1264_v21 }
  0x55   : > { %1234 = vmatmul.msk.f32.gmra.mxu1 %vm254_vm1, %v1262_v17 }
  0x5b   : > { %1302 = vmatmul.msk.f32.gmra.mxu2 %vm254_vm1, %v1267_v27 }
  0x5c   : > { %1251 = vmatmul.msk.f32.vlgmr.msrb.gmra.mxu3 %vm254_vm1, %v1662_v26  ;;  %1202 = vmatmul.msk.f32.gmra.mxu0 %vm254_vm1, %v1265_v23 }
  0x5d   : > { %1235 = vmatmul.msk.f32.gmra.mxu1 %vm254_vm1, %v1263_v19 }
  0x63   : > { %1303 = vmatmul.msk.f32.gmra.mxu2 %vm254_vm1, %v1268_v29 }
  0x64   : > { %1252 = vmatmul.msk.f32.gmra.mxu3 %vm254_vm1, %v1671_v28  ;;  %1203 = vmatmul.msk.f32.gmra.mxu0 %vm254_vm1, %v1266_v25 }
  0x65   : > { %1236 = vmatmul.msk.f32.gmra.mxu1 %vm254_vm1, %v1264_v21 }
  0x6b   : > { %1304 = vmatmul.msk.f32.gmra.mxu2 %vm254_vm1, %v1269_v30 }
  0x6c   : > { %1253 = vmatmul.msk.f32.gmra.mxu3 %vm254_vm1, %v1585_v6  ;;  %1204 = vmatmul.msk.f32.gmra.mxu0 %vm254_vm1, %v1267_v27 }
  0x6d   : > { %1237 = vmatmul.msk.f32.gmra.mxu1 %vm254_vm1, %v1265_v23 }
  0x73   : > { %1305 = vmatmul.msk.f32.gmra.mxu2 %vm254_vm1, %v1270_v31 }
  0x74   : > { %1254 = vmatmul.msk.f32.gmra.mxu3 %vm254_vm1, %v1597_v10  ;;  %1205 = vmatmul.msk.f32.gmra.mxu0 %vm254_vm1, %v1268_v29 }
  0x75   : > { %1238 = vmatmul.msk.f32.gmra.mxu1 %vm254_vm1, %v1266_v25 }
  0x7b   : > { %1306 = vmatmul.msk.f32.gmra.mxu2 %vm254_vm1, %v1271_v32 }
  0x7c   : > { %1255 = vmatmul.msk.f32.gmra.mxu3 %vm254_vm1, %v1608_v14  ;;  %1206 = vmatmul.msk.f32.gmra.mxu0 %vm254_vm1, %v1269_v30 }
  0x7d   : > { %1239 = vmatmul.msk.f32.gmra.mxu1 %vm254_vm1, %v1267_v27  ;;  %v1289_v27 = vld [vmem:[%s1582_s23 + $0x110] sm:$0xff] }
  0x83   : > { %1307 = vmatmul.msk.f32.gmra.mxu2 %vm254_vm1, %v1272_v33 }
  0x84   : > { %1256 = vmatmul.msk.f32.gmra.mxu3 %vm254_vm1, %v1617_v16  ;;  %1207 = vmatmul.msk.f32.gmra.mxu0 %vm254_vm1, %v1270_v31 }
  0x85   : > { %1240 = vmatmul.msk.f32.gmra.mxu1 %vm254_vm1, %v1268_v29 }
  0x8b   : > { %1308 = vmatmul.msk.f32.gmra.mxu2 %vm254_vm1, %v1273_v34 }
  0x8c   : > { %1257 = vmatmul.msk.f32.gmra.mxu3 %vm254_vm1, %v1626_v18  ;;  %1208 = vmatmul.msk.f32.gmra.mxu0 %vm254_vm1, %v1271_v32 }
  0x8d   : > { %1241 = vmatmul.msk.f32.gmra.mxu1 %vm254_vm1, %v1269_v30 }
  0x93   : > { %1309 = vmatmul.msk.f32.gmra.mxu2 %vm254_vm1, %v1274_v35 }
  0x94   : > { %1258 = vmatmul.msk.f32.gmra.mxu3 %vm254_vm1, %v1635_v20  ;;  %1209 = vmatmul.msk.f32.gmra.mxu0 %vm254_vm1, %v1272_v33 }
  0x95   : > { %1242 = vmatmul.msk.f32.gmra.mxu1 %vm254_vm1, %v1270_v31 }
  0x99   : > { %v372_v37 = vpop.f32.mrf.mxu0 }
  0x9a   : > { %v584_v38 = vpop.f32.mrf.mxu1 }
  0x9b   : > { %1310 = vmatmul.msk.f32.gmra.mxu2 %vm254_vm1, %v1716_v36  ;;  %v585_v39 = vadd.f32 %v584_v38, %v372_v37 }
  0x9c   : > { %1318 = vmatmul.msk.f32.vlgmr.msra.gmra.mxu3 %vm254_vm1, %v1608_v14  ;;  %1210 = vmatmul.msk.f32.gmra.mxu0 %vm254_vm1, %v1273_v34 }
  0x9d   : > { %1243 = vmatmul.msk.f32.gmra.mxu1 %vm254_vm1, %v1271_v32 }
  0x9e   : > { %v832_v42 = vpop.f32.mrf.mxu2 }
  0x9f   : > { %v1730_v41 = vpop.f32.mrf.mxu3  ;;  %v928_v43 = vadd.f32 %v832_v42, %v585_v39 }
  0xa1   : > { %v964_v45 = vadd.f32 %v1728_v40, %v928_v43  ;;  %v375_v46 = vpop.f32.mrf.mxu0 }
  0xa2   : > { %v587_v47 = vpop.f32.mrf.mxu1 }
  0xa3   : > { %v996_v48 = vmax.f32 %v964_v45, 0.0  ;;  %1311 = vmatmul.msk.f32.gmra.mxu2 %vm254_vm1, %v1735_v44  ;;  %v588_v49 = vadd.f32 %v587_v47, %v375_v46 }
  0xa4   : > { %1319 = vmatmul.msk.f32.gmra.mxu3 %vm254_vm1, %v1617_v16  ;;  %1211 = vmatmul.msk.f32.gmra.mxu0 %vm254_vm1, %v1274_v35 }
  0xa5   : > { %1244 = vmatmul.msk.f32.gmra.mxu1 %vm254_vm1, %v1272_v33  ;;  %1028 = vst [vmem:[%s1744_s30] sm:$0xff] %v996_v48 }
  0xa6   : > { %v835_v51 = vpop.f32.mrf.mxu2 }
  0xa7   : > { %v1747_v50 = vpop.f32.mrf.mxu3  ;;  %v929_v52 = vadd.f32 %v835_v51, %v588_v49 }
  0xa9   : > { %v965_v54 = vadd.f32 %v1728_v40, %v929_v52  ;;  %v378_v55 = vpop.f32.mrf.mxu0 }
  0xaa   : > { %v590_v56 = vpop.f32.mrf.mxu1 }
  0xab   : > { %v997_v57 = vmax.f32 %v965_v54, 0.0  ;;  %1312 = vmatmul.msk.f32.gmra.mxu2 %vm254_vm1, %v1750_v53  ;;  %v591_v58 = vadd.f32 %v590_v56, %v378_v55 }
  0xac   : > { %1320 = vmatmul.msk.f32.gmra.mxu3 %vm254_vm1, %v1626_v18  ;;  %1212 = vmatmul.msk.f32.gmra.mxu0 %vm254_vm1, %v1716_v36 }
  0xad   : > { %1245 = vmatmul.msk.f32.gmra.mxu1 %vm254_vm1, %v1273_v34  ;;  %1029 = vst [vmem:[%s1744_s30 + $0x8] sm:$0xff] %v997_v57 }
  0xae   : > { %v838_v60 = vpop.f32.mrf.mxu2 }
  0xaf   : > { %v1761_v59 = vpop.f32.mrf.mxu3  ;;  %v930_v61 = vadd.f32 %v838_v60, %v591_v58 }
  0xb1   : > { %v966_v63 = vadd.f32 %v1728_v40, %v930_v61  ;;  %v381_v0 = vpop.f32.mrf.mxu0 }
  0xb2   : > { %v593_v1 = vpop.f32.mrf.mxu1 }
  0xb3   : > { %v998_v2 = vmax.f32 %v966_v63, 0.0  ;;  %1313 = vmatmul.msk.f32.gmra.mxu2 %vm254_vm1, %v1764_v62  ;;  %v594_v3 = vadd.f32 %v593_v1, %v381_v0 }
  0xb4   : > { %1321 = vmatmul.msk.f32.gmra.mxu3 %vm254_vm1, %v1635_v20  ;;  %1213 = vmatmul.msk.f32.gmra.mxu0 %vm254_vm1, %v1735_v44 }
  0xb5   : > { %1246 = vmatmul.msk.f32.gmra.mxu1 %vm254_vm1, %v1274_v35  ;;  %1030 = vst [vmem:[%s1744_s30 + $0x10] sm:$0xff] %v998_v2 }
  0xb6   : > { %v841_v5 = vpop.f32.mrf.mxu2 }
  0xb7   : > { %v1775_v4 = vpop.f32.mrf.mxu3  ;;  %v931_v7 = vadd.f32 %v841_v5, %v594_v3 }
  0xb9   : > { %v967_v8 = vadd.f32 %v1728_v40, %v931_v7  ;;  %v384_v9 = vpop.f32.mrf.mxu0 }
  0xba   : > { %v596_v11 = vpop.f32.mrf.mxu1 }
  0xbb   : > { %v999_v12 = vmax.f32 %v967_v8, 0.0  ;;  %1314 = vmatmul.msk.f32.gmra.mxu2 %vm254_vm1, %v1662_v26  ;;  %v597_v13 = vadd.f32 %v596_v11, %v384_v9 }
  0xbc   : > { %1322 = vmatmul.msk.f32.gmra.mxu3 %vm254_vm1, %v1644_v22  ;;  %1214 = vmatmul.msk.f32.gmra.mxu0 %vm254_vm1, %v1750_v53 }
  0xbd   : > { %1247 = vmatmul.msk.f32.gmra.mxu1 %vm254_vm1, %v1716_v36  ;;  %1031 = vst [vmem:[%s1744_s30 + $0x18] sm:$0xff] %v999_v12  ;;  %v1290_v36 = vld [vmem:[%s1582_s23 + $0x118] sm:$0xff] }
  0xbe   : > { %v844_v15 = vpop.f32.mrf.mxu2 }
  0xbf   : > { %v1787_v14 = vpop.f32.mrf.mxu3  ;;  %v932_v16 = vadd.f32 %v844_v15, %v597_v13 }
  0xc1   : > { %v968_v17 = vadd.f32 %v1728_v40, %v932_v16  ;;  %v387_v18 = vpop.f32.mrf.mxu0 }
  0xc2   : > { %v599_v19 = vpop.f32.mrf.mxu1 }
  0xc3   : > { %v1000_v20 = vmax.f32 %v968_v17, 0.0  ;;  %1315 = vmatmul.msk.f32.gmra.mxu2 %vm254_vm1, %v1671_v28  ;;  %v600_v21 = vadd.f32 %v599_v19, %v387_v18 }
  0xc4   : > { %1323 = vmatmul.msk.f32.gmra.mxu3 %vm254_vm1, %v1653_v24  ;;  %1215 = vmatmul.msk.f32.gmra.mxu0 %vm254_vm1, %v1764_v62 }
  0xc5   : > { %1248 = vmatmul.msk.f32.gmra.mxu1 %vm254_vm1, %v1735_v44  ;;  %1032 = vst [vmem:[%s1744_s30 + $0x20] sm:$0xff] %v1000_v20 }
  0xc6   : > { %v847_v23 = vpop.f32.mrf.mxu2 }
  0xc7   : > { %v1799_v22 = vpop.f32.mrf.mxu3  ;;  %v933_v25 = vadd.f32 %v847_v23, %v600_v21 }
  0xc9   : > { %v969_v29 = vadd.f32 %v1728_v40, %v933_v25  ;;  %v390_v30 = vpop.f32.mrf.mxu0 }
  0xca   : > { %v602_v31 = vpop.f32.mrf.mxu1 }
  0xcb   : > { %v1001_v24 = vmax.f32 %v969_v29, 0.0  ;;  %1316 = vmatmul.msk.f32.gmra.mxu2 %vm254_vm1, %v1585_v6  ;;  %v603_v32 = vadd.f32 %v602_v31, %v390_v30 }
  0xcc   : > { %1324 = vmatmul.msk.f32.gmra.mxu3 %vm254_vm1, %v1289_v27  ;;  %1216 = vmatmul.msk.f32.gmra.mxu0 %vm254_vm1, %v1662_v26 }
  0xcd   : > { %1249 = vmatmul.msk.f32.gmra.mxu1 %vm254_vm1, %v1750_v53  ;;  %1033 = vst [vmem:[%s1744_s30 + $0x28] sm:$0xff] %v1001_v24 }
  0xce   : > { %v850_v34 = vpop.f32.mrf.mxu2 }
  0xcf   : > { %v1811_v33 = vpop.f32.mrf.mxu3  ;;  %v934_v35 = vadd.f32 %v850_v34, %v603_v32 }
  0xd1   : > { %v970_v37 = vadd.f32 %v1728_v40, %v934_v35  ;;  %v393_v38 = vpop.f32.mrf.mxu0 }
  0xd2   : > { %v605_v6 = vpop.f32.mrf.mxu1 }
  0xd3   : > { %v1002_v39 = vmax.f32 %v970_v37, 0.0  ;;  %1317 = vmatmul.msk.f32.gmra.mxu2 %vm254_vm1, %v1597_v10  ;;  %v606_v26 = vadd.f32 %v605_v6, %v393_v38 }
  0xd4   : > { %1325 = vmatmul.msk.f32.gmra.mxu3 %vm254_vm1, %v1290_v36  ;;  %1217 = vmatmul.msk.f32.gmra.mxu0 %vm254_vm1, %v1671_v28 }
  0xd5   : > { %1250 = vmatmul.msk.f32.gmra.mxu1 %vm254_vm1, %v1764_v62  ;;  %1034 = vst [vmem:[%s1744_s30 + $0x30] sm:$0xff] %v1002_v39 }
  0xd6   : > { %v853_v43 = vpop.f32.mrf.mxu2 }
  0xd7   : > { %v1823_v42 = vpop.f32.mrf.mxu3  ;;  %v935_v44 = vadd.f32 %v853_v43, %v606_v26 }
  0xd9   : > { %v971_v45 = vadd.f32 %v1728_v40, %v935_v44  ;;  %v396_v46 = vpop.f32.mrf.mxu0 }
  0xda   : > { %v608_v47 = vpop.f32.mrf.mxu1 }
  0xdb   : > { %v1003_v10 = vmax.f32 %v971_v45, 0.0  ;;  %v609_v48 = vadd.f32 %v608_v47, %v396_v46 }
  0xdd   : > { %1035 = vst [vmem:[%s1744_s30 + $0x38] sm:$0xff] %v1003_v10 }
  0xde   : > { %v856_v51 = vpop.f32.mrf.mxu2 }
  0xdf   : > { %v1827_v49 = vpop.f32.mrf.mxu3  ;;  %v936_v28 = vadd.f32 %v856_v51, %v609_v48 }
  0xe1   : > { %v972_v52 = vadd.f32 %v1728_v40, %v936_v28  ;;  %v399_v53 = vpop.f32.mrf.mxu0 }
  0xe2   : > { %v611_v54 = vpop.f32.mrf.mxu1 }
  0xe3   : > { %v1004_v55 = vmax.f32 %v972_v52, 0.0  ;;  %v612_v56 = vadd.f32 %v611_v54, %v399_v53 }
  0xe5   : > { %1036 = vst [vmem:[%s1744_s30 + $0x40] sm:$0xff] %v1004_v55 }
  0xe6   : > { %v859_v58 = vpop.f32.mrf.mxu2 }
  0xe7   : > { %v1831_v57 = vpop.f32.mrf.mxu3  ;;  %v937_v60 = vadd.f32 %v859_v58, %v612_v56 }
  0xe9   : > { %v973_v61 = vadd.f32 %v1728_v40, %v937_v60  ;;  %v402_v62 = vpop.f32.mrf.mxu0 }
  0xea   : > { %v614_v63 = vpop.f32.mrf.mxu1 }
  0xeb   : > { %v1005_v0 = vmax.f32 %v973_v61, 0.0  ;;  %v615_v1 = vadd.f32 %v614_v63, %v402_v62  ;;  %v657_v61 = vadd.f32 %v1827_v49, %v1730_v41 }
  0xed   : > { %1037 = vst [vmem:[%s1744_s30 + $0x48] sm:$0xff] %v1005_v0 }
  0xee   : > { %v862_v3 = vpop.f32.mrf.mxu2 }
  0xef   : > { %v1835_v2 = vpop.f32.mrf.mxu3  ;;  %v938_v5 = vadd.f32 %v862_v3, %v615_v1 }
  0xf1   : > { %v974_v7 = vadd.f32 %v1728_v40, %v938_v5  ;;  %v405_v8 = vpop.f32.mrf.mxu0 }
  0xf2   : > { %v617_v9 = vpop.f32.mrf.mxu1 }
  0xf3   : > { %v1006_v11 = vmax.f32 %v974_v7, 0.0  ;;  %v618_v12 = vadd.f32 %v617_v9, %v405_v8 }
  0xf5   : > { %1038 = vst [vmem:[%s1744_s30 + $0x50] sm:$0xff] %v1006_v11 }
  0xf6   : > { %v865_v15 = vpop.f32.mrf.mxu2 }
  0xf7   : > { %v1839_v13 = vpop.f32.mrf.mxu3  ;;  %v939_v16 = vadd.f32 %v865_v15, %v618_v12  ;;  %v660_v15 = vadd.f32 %v1831_v57, %v1747_v50  ;;  %v663_v50 = vadd.f32 %v1835_v2, %v1761_v59 }
  0xf8   : > { %v666_v59 = vadd.f32 %v1839_v13, %v1775_v4 }
  0xf9   : > { %v975_v17 = vadd.f32 %v1728_v40, %v939_v16  ;;  %v408_v18 = vpop.f32.mrf.mxu0 }
  0xfa   : > { %v620_v19 = vpop.f32.mrf.mxu1 }
  0xfb   : > { %v1007_v20 = vmax.f32 %v975_v17, 0.0  ;;  %v621_v21 = vadd.f32 %v620_v19, %v408_v18 }
  0xfd   : > { %1039 = vst [vmem:[%s1744_s30 + $0x58] sm:$0xff] %v1007_v20 }
  0xfe   : > { %v868_v25 = vpop.f32.mrf.mxu2 }
  0xff   : > { %v1843_v23 = vpop.f32.mrf.mxu3  ;;  %v940_v27 = vadd.f32 %v868_v25, %v621_v21 }
 0x100   : > { %v669_v4 = vadd.f32 %v1843_v23, %v1787_v14 }
 0x101   : > { %v976_v29 = vadd.f32 %v1728_v40, %v940_v27  ;;  %v411_v30 = vpop.f32.mrf.mxu0 }
 0x102   : > { %v623_v31 = vpop.f32.mrf.mxu1 }
 0x103   : > { %v1008_v24 = vmax.f32 %v976_v29, 0.0  ;;  %v624_v32 = vadd.f32 %v623_v31, %v411_v30 }
 0x105   : > { %1040 = vst [vmem:[%s1744_s30 + $0x60] sm:$0xff] %v1008_v24 }
 0x106   : > { %v871_v35 = vpop.f32.mrf.mxu2 }
 0x107   : > { %v1847_v34 = vpop.f32.mrf.mxu3  ;;  %v941_v36 = vadd.f32 %v871_v35, %v624_v32 }
 0x108   : > { %v672_v14 = vadd.f32 %v1847_v34, %v1799_v22 }
 0x109   : > { %v977_v37 = vadd.f32 %v1728_v40, %v941_v36  ;;  %v414_v38 = vpop.f32.mrf.mxu0 }
 0x10a   : > { %v626_v6 = vpop.f32.mrf.mxu1 }
 0x10b   : > { %v1009_v39 = vmax.f32 %v977_v37, 0.0  ;;  %v627_v26 = vadd.f32 %v626_v6, %v414_v38 }
 0x10d   : > { %1041 = vst [vmem:[%s1744_s30 + $0x68] sm:$0xff] %v1009_v39 }
 0x10e   : > { %v874_v44 = vpop.f32.mrf.mxu2 }
 0x10f   : > { %v1851_v43 = vpop.f32.mrf.mxu3  ;;  %v942_v45 = vadd.f32 %v874_v44, %v627_v26 }
 0x110   : > { %v675_v22 = vadd.f32 %v1851_v43, %v1811_v33 }
 0x111   : > { %v978_v46 = vadd.f32 %v1728_v40, %v942_v45  ;;  %v417_v47 = vpop.f32.mrf.mxu0 }
 0x112   : > { %v629_v10 = vpop.f32.mrf.mxu1 }
 0x113   : > { %v1010_v48 = vmax.f32 %v978_v46, 0.0  ;;  %v630_v51 = vadd.f32 %v629_v10, %v417_v47 }
 0x115   : > { %1042 = vst [vmem:[%s1744_s30 + $0x70] sm:$0xff] %v1010_v48 }
 0x116   : > { %v877_v52 = vpop.f32.mrf.mxu2 }
 0x117   : > { %v1855_v28 = vpop.f32.mrf.mxu3  ;;  %v943_v53 = vadd.f32 %v877_v52, %v630_v51 }
 0x118   : > { %v678_v33 = vadd.f32 %v1855_v28, %v1823_v42 }
 0x119   : > { %v979_v54 = vadd.f32 %v1728_v40, %v943_v53  ;;  %v420_v55 = vpop.f32.mrf.mxu0 }
 0x11a   : > { %v632_v56 = vpop.f32.mrf.mxu1 }
 0x11b   : > { %v1011_v58 = vmax.f32 %v979_v54, 0.0  ;;  %v633_v60 = vadd.f32 %v632_v56, %v420_v55 }
 0x11d   : > { %1043 = vst [vmem:[%s1744_s30 + $0x78] sm:$0xff] %v1011_v58 }
 0x11e   : > { %v880_v62 = vpop.f32.mrf.mxu2 }
 0x11f   : > { %v904_v63 = vpop.f32.mrf.mxu3  ;;  %v944_v0 = vadd.f32 %v880_v62, %v633_v60 }
 0x120   : > { %v952_v1 = vadd.f32 %v904_v63, %v657_v61 }
 0x121   : > { %v980_v3 = vadd.f32 %v1728_v40, %v944_v0  ;;  %v423_v7 = vpop.f32.mrf.mxu0 }
 0x122   : > { %v988_v5 = vadd.f32 %v1728_v40, %v952_v1  ;;  %v635_v8 = vpop.f32.mrf.mxu1 }
 0x123   : > { %v1012_v9 = vmax.f32 %v980_v3, 0.0  ;;  %v636_v12 = vadd.f32 %v635_v8, %v423_v7 }
 0x124   : > { %v1020_v11 = vmax.f32 %v988_v5, 0.0 }
 0x125   : > { %1044 = vst [vmem:[%s1744_s30 + $0x80] sm:$0xff] %v1012_v9 }
 0x126   : > { %1052 = vst [vmem:[%s1744_s30 + $0xc0] sm:$0xff] %v1020_v11  ;;  %v883_v41 = vpop.f32.mrf.mxu2 }
 0x127   : > { %v907_v49 = vpop.f32.mrf.mxu3  ;;  %v945_v16 = vadd.f32 %v883_v41, %v636_v12 }
 0x128   : > { %v953_v17 = vadd.f32 %v907_v49, %v660_v15 }
 0x129   : > { %v981_v18 = vadd.f32 %v1728_v40, %v945_v16  ;;  %v426_v20 = vpop.f32.mrf.mxu0 }
 0x12a   : > { %v989_v19 = vadd.f32 %v1728_v40, %v953_v17  ;;  %v638_v21 = vpop.f32.mrf.mxu1 }
 0x12b   : > { %v1013_v25 = vmax.f32 %v981_v18, 0.0  ;;  %v639_v29 = vadd.f32 %v638_v21, %v426_v20 }
 0x12c   : > { %v1021_v27 = vmax.f32 %v989_v19, 0.0 }
 0x12d   : > { %1045 = vst [vmem:[%s1744_s30 + $0x88] sm:$0xff] %v1013_v25 }
 0x12e   : > { %1053 = vst [vmem:[%s1744_s30 + $0xc8] sm:$0xff] %v1021_v27  ;;  %v886_v57 = vpop.f32.mrf.mxu2 }
 0x12f   : > { %v910_v30 = vpop.f32.mrf.mxu3  ;;  %v946_v31 = vadd.f32 %v886_v57, %v639_v29 }
 0x130   : > { %v954_v24 = vadd.f32 %v910_v30, %v663_v50 }
 0x131   : > { %v982_v32 = vadd.f32 %v1728_v40, %v946_v31  ;;  %v429_v36 = vpop.f32.mrf.mxu0 }
 0x132   : > { %v990_v35 = vadd.f32 %v1728_v40, %v954_v24  ;;  %v641_v37 = vpop.f32.mrf.mxu1 }
 0x133   : > { %v1014_v38 = vmax.f32 %v982_v32, 0.0  ;;  %v642_v39 = vadd.f32 %v641_v37, %v429_v36 }
 0x134   : > { %v1022_v6 = vmax.f32 %v990_v35, 0.0 }
 0x135   : > { %1046 = vst [vmem:[%s1744_s30 + $0x90] sm:$0xff] %v1014_v38 }
 0x136   : > { %1054 = vst [vmem:[%s1744_s30 + $0xd0] sm:$0xff] %v1022_v6  ;;  %v889_v2 = vpop.f32.mrf.mxu2 }
 0x137   : > { %v913_v26 = vpop.f32.mrf.mxu3  ;;  %v947_v44 = vadd.f32 %v889_v2, %v642_v39 }
 0x138   : > { %v955_v45 = vadd.f32 %v913_v26, %v666_v59 }
 0x139   : > { %v983_v46 = vadd.f32 %v1728_v40, %v947_v44  ;;  %v432_v10 = vpop.f32.mrf.mxu0 }
 0x13a   : > { %v991_v47 = vadd.f32 %v1728_v40, %v955_v45  ;;  %v644_v48 = vpop.f32.mrf.mxu1 }
 0x13b   : > { %v1015_v51 = vmax.f32 %v983_v46, 0.0  ;;  %v645_v53 = vadd.f32 %v644_v48, %v432_v10 }
 0x13c   : > { %v1023_v52 = vmax.f32 %v991_v47, 0.0 }
 0x13d   : > { %1047 = vst [vmem:[%s1744_s30 + $0x98] sm:$0xff] %v1015_v51 }
 0x13e   : > { %1055 = vst [vmem:[%s1744_s30 + $0xd8] sm:$0xff] %v1023_v52  ;;  %v892_v13 = vpop.f32.mrf.mxu2 }
 0x13f   : > { %v916_v54 = vpop.f32.mrf.mxu3  ;;  %v948_v55 = vadd.f32 %v892_v13, %v645_v53 }
 0x140   : > { %v956_v56 = vadd.f32 %v916_v54, %v669_v4 }
 0x141   : > { %v984_v58 = vadd.f32 %v1728_v40, %v948_v55  ;;  %v435_v61 = vpop.f32.mrf.mxu0 }
 0x142   : > { %v992_v60 = vadd.f32 %v1728_v40, %v956_v56  ;;  %v647_v62 = vpop.f32.mrf.mxu1 }
 0x143   : > { %v1016_v63 = vmax.f32 %v984_v58, 0.0  ;;  %v648_v1 = vadd.f32 %v647_v62, %v435_v61 }
 0x144   : > { %v1024_v0 = vmax.f32 %v992_v60, 0.0 }
 0x145   : > { %1048 = vst [vmem:[%s1744_s30 + $0xa0] sm:$0xff] %v1016_v63 }
 0x146   : > { %1056 = vst [vmem:[%s1744_s30 + $0xe0] sm:$0xff] %v1024_v0  ;;  %v895_v23 = vpop.f32.mrf.mxu2 }
 0x147   : > { %v919_v3 = vpop.f32.mrf.mxu3  ;;  %v949_v5 = vadd.f32 %v895_v23, %v648_v1 }
 0x148   : > { %v957_v7 = vadd.f32 %v919_v3, %v672_v14 }
 0x149   : > { %v985_v8 = vadd.f32 %v1728_v40, %v949_v5  ;;  %v438_v11 = vpop.f32.mrf.mxu0 }
 0x14a   : > { %v993_v9 = vadd.f32 %v1728_v40, %v957_v7  ;;  %v650_v12 = vpop.f32.mrf.mxu1 }
 0x14b   : > { %v1017_v15 = vmax.f32 %v985_v8, 0.0  ;;  %v651_v49 = vadd.f32 %v650_v12, %v438_v11 }
 0x14c   : > { %v1025_v41 = vmax.f32 %v993_v9, 0.0 }
 0x14d   : > { %1049 = vst [vmem:[%s1744_s30 + $0xa8] sm:$0xff] %v1017_v15 }
 0x14e   : > { %1057 = vst [vmem:[%s1744_s30 + $0xe8] sm:$0xff] %v1025_v41  ;;  %v898_v34 = vpop.f32.mrf.mxu2 }
 0x14f   : > { %v922_v16 = vpop.f32.mrf.mxu3  ;;  %v950_v17 = vadd.f32 %v898_v34, %v651_v49 }
 0x150   : > { %v958_v18 = vadd.f32 %v922_v16, %v675_v22 }
 0x151   : > { %v986_v19 = vadd.f32 %v1728_v40, %v950_v17  ;;  %v441_v21 = vpop.f32.mrf.mxu0 }
 0x152   : > { %v994_v20 = vadd.f32 %v1728_v40, %v958_v18  ;;  %v653_v25 = vpop.f32.mrf.mxu1 }
 0x153   : > { %v1018_v27 = vmax.f32 %v986_v19, 0.0  ;;  %v654_v50 = vadd.f32 %v653_v25, %v441_v21 }
 0x154   : > { %v1026_v29 = vmax.f32 %v994_v20, 0.0 }
 0x155   : > { %1050 = vst [vmem:[%s1744_s30 + $0xb0] sm:$0xff] %v1018_v27 }
 0x156   : > { %1058 = vst [vmem:[%s1744_s30 + $0xf0] sm:$0xff] %v1026_v29  ;;  %v901_v43 = vpop.f32.mrf.mxu2 }
 0x157   : > { %v925_v57 = vpop.f32.mrf.mxu3  ;;  %v951_v30 = vadd.f32 %v901_v43, %v654_v50 }
 0x158   : > { %v959_v31 = vadd.f32 %v925_v57, %v678_v33 }
 0x159   : > { %v987_v24 = vadd.f32 %v1728_v40, %v951_v30 }
 0x15a   : > { %v995_v42 = vadd.f32 %v1728_v40, %v959_v31 }
 0x15b   : > { %v1019_v28 = vmax.f32 %v987_v24, 0.0 }
 0x15c   : > { %v1027_v32 = vmax.f32 %v995_v42, 0.0 }
 0x15d   : > { %1051 = vst [vmem:[%s1744_s30 + $0xb8] sm:$0xff] %v1019_v28 }
 0x15e   : > { %1059 = vst [vmem:[%s1744_s30 + $0xf8] sm:$0xff] %v1027_v32 }
 0x15f   : > { %1424 = shalt.err (!%p1421_p5)
}
 0x160   : > { %s1477_s26 = smov 128   ;;  %s1478_s28 = smov 8  }
 0x161   : > { %1339 = dma.vmem_to_hbm [thread:$0]  (%p1539_p4), %s1077_s15, 4096, %s1079_s8, %s1061_s9, %s1477_s26, %s1477_s26, %s1478_s28  }
 0x162 PF: > { %p1345_p6 = scmp.ge.s32.totalorder %s1475_s17, 2  ;;  %s1093_s29 = sand.u32 1, %s1455_s12  }
 0x163   : > { %s1094_s30 = scalar_lea.sflag [#allocation3], %s1093_s29 }
 0x164   : > { %p1342_p7 = pnand %p1345_p6, %p1546_p8 }
 0x166   : > { %p1343_p9 = pneg %p1342_p7 }
 0x168   : > { %1450 = dma.done.wait (%p1343_p9), %s1094_s30, 4096  }
 0x169   : > { %1452 = vsyncadd (%p1343_p9), %s1094_s30, 4294963200  ;;  %s16_s17 = sadd.s32 1, %s1475_s17   ;;  %s1952_s12 = smov %s1459_s13 }
 0x16a   : > { %p13_p10 = scmp.ge.s32.totalorder %s16_s17, 4   ;;  %s1953_s13 = smov %s1463_s14 }
 0x16b   : > { %s1954_s14 = smov %s1552_s25  ;;  %s1955_s15 = smov %s1471_s16 }
 0x16c   : > { %s1956_s16 = smov %s1958_s20  ;;  %15 = sbr.rel (!%p13_p10) target bundleno = 4 (0x4), region = 71 }
 0x171   :  { %1100 = vsyncpa [#allocation3], 1 }
 0x172   :  { %1102 = vsyncpa [#allocation3 + $0x1], 1 }

</bundles_post_ra>
